<compile_context>
chip_gen: v5e
topology: v5e:2x2
jax: 0.10.0
libtpu: 0.0.40
codegen_flags: <defaults>
</compile_context>

<pallas_src>
import functools

import jax
import jax.numpy as jnp
from jax.experimental import pallas as pl
from jax.experimental.pallas import tpu as pltpu


def _round_up(x, m):
    return ((x + m - 1) // m) * m


def _round_down(x, m):
    return (x // m) * m


def _device_generation():
    try:
        kind = jax.devices()[0].device_kind.lower()
    except Exception:
        return "unknown"
    if "v7" in kind or "7x" in kind:
        return "v7x"
    if "v6" in kind:
        return "v6e"
    if "v5" in kind:
        return "v5e"
    return "unknown"


# (pipeline VMEM budget, max batch tile, vmem_limit cap, two TensorCores)
_GEN_CFG = {
    "v5e": (12 << 20, 2048, 64 << 20, False),
    "v6e": (28 << 20, 4096, 64 << 20, False),
    "v7x": (40 << 20, 8192, 48 << 20, True),
    "unknown": (20 << 20, 2048, 48 << 20, False),
}


def _fused_concat_linear_sigmoid_kernel(*refs):
    """refs = (x1..x6 tiles, w1..w6 resident chunks, bias, out tile).

    xi_ref: [TB, Fi]  feature tiles (VMEM)
    wi_ref: [Fi, C]   per-feature weight chunk (VMEM, resident across steps)
    b_ref : [1, C]    bias (VMEM, resident)
    o_ref : [TB, C]   output tile
    """
    n = (len(refs) - 2) // 2
    x_refs = refs[:n]
    w_refs = refs[n:2 * n]
    b_ref = refs[2 * n]
    o_ref = refs[2 * n + 1]

    # Fused equivalent of concat(x1..x6, -1) @ W^T, accumulated in f32.
    acc = jnp.dot(x_refs[0][...], w_refs[0][...],
                  preferred_element_type=jnp.float32)
    for x_ref, w_ref in zip(x_refs[1:], w_refs[1:]):
        acc = acc + jnp.dot(x_ref[...], w_ref[...],
                            preferred_element_type=jnp.float32)
    acc = acc + b_ref[...].astype(jnp.float32)
    o_ref[...] = jax.nn.sigmoid(acc).astype(o_ref.dtype)


@functools.partial(jax.jit, static_argnames=("block_b", "input_buffering"))
def combined_linear_sigmoid(x1, x2, x3, x4, x5, x6, w_t, b, *,
                            block_b=None, input_buffering=None):
    """y = sigmoid(concat(x1..x6, -1) @ w_t + b), concat fused into the kernel.

    x1..x3: [B, num_outputs*3], x4..x6: [B, num_outputs*2]
    w_t   : [15*num_outputs, C]  (torch Linear weight, transposed)
    b     : [C]
    block_b: optional explicit batch-tile cap (rounded up to a multiple of 8);
             by default the tile is derived from a per-generation VMEM budget.
    """
    xs = (x1, x2, x3, x4, x5, x6)
    B = int(x1.shape[0])
    feat = tuple(int(x.shape[1]) for x in xs)
    F = sum(feat)
    C = int(w_t.shape[1])
    assert w_t.shape[0] == F, (w_t.shape, F)

    out_dtype = jnp.result_type(x1.dtype, w_t.dtype)
    in_itemsize = jnp.dtype(x1.dtype).itemsize
    w_itemsize = jnp.dtype(w_t.dtype).itemsize
    out_itemsize = jnp.dtype(out_dtype).itemsize

    gen = _device_generation()
    budget, tb_cap, vmem_cap, two_tc = _GEN_CFG[gen]
    if block_b is not None:
        tb_cap = _round_up(int(block_b), 8)

    # Batch tile from the VMEM budget: inputs + output are double-buffered per
    # row, the six weight chunks and bias are resident (count them twice to be
    # safe about buffering).
    resident = 2 * (F * C + C) * w_itemsize
    per_row = 2 * (F * in_itemsize + C * out_itemsize)
    tb = _round_down(max(budget - resident, 8 * per_row) // per_row, 8)
    tb = min(tb, tb_cap, _round_up(B, 8))
    # On a 2-TensorCore chip keep >= 2 "parallel" grid steps so both cores and
    # both DMA engines get work.
    if two_tc and B >= 16:
        tb = min(tb, _round_up(pl.cdiv(B, 2), 8))
    tb = max(8, tb)

    # Ragged last block handled by Pallas: OOB output rows are dropped, edge
    # input padding only feeds those dropped rows (row-wise op, no batch
    # reduction inside the kernel).
    grid = (pl.cdiv(B, tb),)

    # Pre-split the weight so each per-feature chunk is its own aligned,
    # VMEM-resident ref (no in-kernel row slicing of a shared weight ref).
    w_parts = []
    off = 0
    for f in feat:
        w_parts.append(jax.lax.slice_in_dim(w_t, off, off + f, axis=0))
        off += f
    b2 = b.reshape(1, C)

    if input_buffering:
        x_specs = [pl.BlockSpec((tb, f), lambda i: (i, 0),
                                pipeline_mode=pl.Buffered(int(input_buffering)))
                   for f in feat]
    else:
        x_specs = [pl.BlockSpec((tb, f), lambda i: (i, 0)) for f in feat]
    w_specs = [pl.BlockSpec((f, C), lambda i: (0, 0)) for f in feat]  # resident
    b_spec = pl.BlockSpec((1, C), lambda i: (0, 0))                   # resident
    out_spec = pl.BlockSpec((tb, C), lambda i: (i, 0))

    cost = pl.CostEstimate(
        flops=2 * B * F * C,
        transcendentals=B * C,  # sigmoid exp
        bytes_accessed=(B * F * in_itemsize + F * C * w_itemsize
                        + C * w_itemsize + B * C * out_itemsize))

    needed = 2 * tb * (F * in_itemsize + C * out_itemsize) + resident + (4 << 20)
    vmem_limit = int(min(vmem_cap, max(32 << 20, needed)))

    out = pl.pallas_call(
        _fused_concat_linear_sigmoid_kernel,
        out_shape=jax.ShapeDtypeStruct((B, C), out_dtype),
        grid=grid,
        in_specs=x_specs + w_specs + [b_spec],
        out_specs=out_spec,
        compiler_params=pltpu.CompilerParams(
            dimension_semantics=("parallel",),
            vmem_limit_bytes=vmem_limit),
        cost_estimate=cost,
    )(*xs, *w_parts, b2)
    return out


def double_combined_classifier_forward(x1, x2, x3, x4, x5, x6, x7, w_t, b, *,
                                       block_b=None, input_buffering=None):
    """Mirrors DoubleCombinedClassifierLogRegTest.forward.  The mode in x7 is a
    Python/trace-time string, exactly as in the torch module."""
    if x7 == 'y_out':
        # TODO(synk): would run the six external frozen backbones and return
        # their raw outputs; the backbones are not part of this module definition.
        return [x1, x2, x3, x4, x5, x6, x7]
    # 'normal' would also run the backbones first; with x1..x6 already being the
    # backbone feature vectors this reduces to the else-branch computation.
    return combined_linear_sigmoid(x1, x2, x3, x4, x5, x6, w_t, b,
                                   block_b=block_b,
                                   input_buffering=input_buffering)


def reference_forward(x1, x2, x3, x4, x5, x6, w_t, b):
    y = jnp.concatenate((x1, x2, x3, x4, x5, x6), axis=-1)
    return jax.nn.sigmoid(y.astype(jnp.float32) @ w_t.astype(jnp.float32)
                          + b[None, :].astype(jnp.float32))


if __name__ == "__main__":
    num_outputs = 32          # -> x1..x3: [B, 96], x4..x6: [B, 64], F = 480
    num_classes = 8

    key = jax.random.PRNGKey(0)
    kw, kb, *ks = jax.random.split(key, 2 + 18)

    in_features = num_outputs * 15  # 480
    bound = 1.0 / (in_features ** 0.5)
    w = jax.random.uniform(kw, (num_classes, in_features), jnp.float32, -bound, bound)
    b = jax.random.uniform(kb, (num_classes,), jnp.float32, -bound, bound)
    w_t = w.T  # kernel expects [F, C]

    def make_inputs(keys, batch):
        widths = (3, 3, 3, 2, 2, 2)
        return tuple(
            jax.random.normal(k, (batch, num_outputs * m), dtype=jnp.float32)
            for k, m in zip(keys, widths))

    # Case 1: batch=32, explicit 8-row tile -> 4-step "parallel" grid with the
    # pre-split resident weight chunks.
    xs32 = make_inputs(ks[:6], 32)
    out32 = double_combined_classifier_forward(*xs32, 'normal', w_t, b, block_b=8)
    out32 = jax.block_until_ready(out32)
    ref32 = reference_forward(*xs32, w_t, b)
    assert out32.shape == (32, num_classes)
    assert jnp.allclose(out32, ref32, atol=1e-5, rtol=1e-5)

    # Case 2: batch=20 with an 8-row tile -> ragged last block (4 valid rows),
    # handled by Pallas with no jnp.pad / extra HBM traffic.
    xs20 = make_inputs(ks[6:12], 20)
    out20 = double_combined_classifier_forward(*xs20, 'normal', w_t, b, block_b=8)
    out20 = jax.block_until_ready(out20)
    ref20 = reference_forward(*xs20, w_t, b)
    assert out20.shape == (20, num_classes)
    assert jnp.allclose(out20, ref20, atol=1e-5, rtol=1e-5)

    # Case 3: batch=2, auto tile selection (generation-aware) -> single padded
    # block, padded rows never written back.
    xs2 = make_inputs(ks[12:18], 2)
    out2 = double_combined_classifier_forward(*xs2, 'normal', w_t, b)
    out2 = jax.block_until_ready(out2)
    ref2 = reference_forward(*xs2, w_t, b)
    assert out2.shape == (2, num_classes)
    assert jnp.allclose(out2, ref2, atol=1e-5, rtol=1e-5)

    print("KERNEL_OK")
</pallas_src>

<mosaic_0001>
module attributes {stable_mosaic.version = 11 : i64} {
  func.func @_fused_concat_linear_sigmoid_kernel(%arg0: i32, %arg1: memref<8x96xf32, #tpu.memory_space<vmem>>, %arg2: memref<8x96xf32, #tpu.memory_space<vmem>>, %arg3: memref<8x96xf32, #tpu.memory_space<vmem>>, %arg4: memref<8x64xf32, #tpu.memory_space<vmem>>, %arg5: memref<8x64xf32, #tpu.memory_space<vmem>>, %arg6: memref<8x64xf32, #tpu.memory_space<vmem>>, %arg7: memref<96x8xf32, #tpu.memory_space<vmem>>, %arg8: memref<96x8xf32, #tpu.memory_space<vmem>>, %arg9: memref<96x8xf32, #tpu.memory_space<vmem>>, %arg10: memref<64x8xf32, #tpu.memory_space<vmem>>, %arg11: memref<64x8xf32, #tpu.memory_space<vmem>>, %arg12: memref<64x8xf32, #tpu.memory_space<vmem>>, %arg13: memref<1x8xf32, #tpu.memory_space<vmem>>, %arg14: memref<8x8xf32, #tpu.memory_space<vmem>>) attributes {dimension_semantics = [#tpu.dimension_semantics<parallel>], iteration_bounds = array<i64: 4>, scalar_prefetch = 0 : i64, scratch_operands = 0 : i64, tpu.core_type = #tpu.core_type<tc>, window_params = [{transform_indices = @transform_0, window_bounds = array<i64: 8, 96>}, {transform_indices = @transform_1, window_bounds = array<i64: 8, 96>}, {transform_indices = @transform_2, window_bounds = array<i64: 8, 96>}, {transform_indices = @transform_3, window_bounds = array<i64: 8, 64>}, {transform_indices = @transform_4, window_bounds = array<i64: 8, 64>}, {transform_indices = @transform_5, window_bounds = array<i64: 8, 64>}, {pipeline_mode = #tpu.pipeline_mode<synchronous>, transform_indices = @transform_6, window_bounds = array<i64: 96, 8>}, {pipeline_mode = #tpu.pipeline_mode<synchronous>, transform_indices = @transform_7, window_bounds = array<i64: 96, 8>}, {pipeline_mode = #tpu.pipeline_mode<synchronous>, transform_indices = @transform_8, window_bounds = array<i64: 96, 8>}, {pipeline_mode = #tpu.pipeline_mode<synchronous>, transform_indices = @transform_9, window_bounds = array<i64: 64, 8>}, {pipeline_mode = #tpu.pipeline_mode<synchronous>, transform_indices = @transform_10, window_bounds = array<i64: 64, 8>}, {pipeline_mode = #tpu.pipeline_mode<synchronous>, transform_indices = @transform_11, window_bounds = array<i64: 64, 8>}, {pipeline_mode = #tpu.pipeline_mode<synchronous>, transform_indices = @transform_12, window_bounds = array<i64: 1, 8>}, {transform_indices = @transform_13, window_bounds = array<i64: 8, 8>}]} {
    %c0 = arith.constant 0 : index
    %c0_0 = arith.constant 0 : index
    %0 = vector.load %arg1[%c0, %c0_0] : memref<8x96xf32, #tpu.memory_space<vmem>>, vector<8x96xf32>
    %c0_1 = arith.constant 0 : index
    %c0_2 = arith.constant 0 : index
    %1 = vector.load %arg7[%c0_1, %c0_2] : memref<96x8xf32, #tpu.memory_space<vmem>>, vector<96x8xf32>
    %cst = arith.constant dense<0.000000e+00> : vector<8x8xf32>
    %2 = tpu.matmul %0, %1, %cst {dimension_numbers = #tpu.dot_dimension_numbers<[1], [0], [0], [1], [0, 0, 1, 1], [], []>} : vector<8x96xf32>, vector<96x8xf32>, vector<8x8xf32> -> vector<8x8xf32>
    %c0_3 = arith.constant 0 : index
    %c0_4 = arith.constant 0 : index
    %3 = vector.load %arg2[%c0_3, %c0_4] : memref<8x96xf32, #tpu.memory_space<vmem>>, vector<8x96xf32>
    %c0_5 = arith.constant 0 : index
    %c0_6 = arith.constant 0 : index
    %4 = vector.load %arg8[%c0_5, %c0_6] : memref<96x8xf32, #tpu.memory_space<vmem>>, vector<96x8xf32>
    %cst_7 = arith.constant dense<0.000000e+00> : vector<8x8xf32>
    %5 = tpu.matmul %3, %4, %cst_7 {dimension_numbers = #tpu.dot_dimension_numbers<[1], [0], [0], [1], [0, 0, 1, 1], [], []>} : vector<8x96xf32>, vector<96x8xf32>, vector<8x8xf32> -> vector<8x8xf32>
    %6 = arith.addf %2, %5 : vector<8x8xf32>
    %c0_8 = arith.constant 0 : index
    %c0_9 = arith.constant 0 : index
    %7 = vector.load %arg3[%c0_8, %c0_9] : memref<8x96xf32, #tpu.memory_space<vmem>>, vector<8x96xf32>
    %c0_10 = arith.constant 0 : index
    %c0_11 = arith.constant 0 : index
    %8 = vector.load %arg9[%c0_10, %c0_11] : memref<96x8xf32, #tpu.memory_space<vmem>>, vector<96x8xf32>
    %cst_12 = arith.constant dense<0.000000e+00> : vector<8x8xf32>
    %9 = tpu.matmul %7, %8, %cst_12 {dimension_numbers = #tpu.dot_dimension_numbers<[1], [0], [0], [1], [0, 0, 1, 1], [], []>} : vector<8x96xf32>, vector<96x8xf32>, vector<8x8xf32> -> vector<8x8xf32>
    %10 = arith.addf %6, %9 : vector<8x8xf32>
    %c0_13 = arith.constant 0 : index
    %c0_14 = arith.constant 0 : index
    %11 = vector.load %arg4[%c0_13, %c0_14] : memref<8x64xf32, #tpu.memory_space<vmem>>, vector<8x64xf32>
    %c0_15 = arith.constant 0 : index
    %c0_16 = arith.constant 0 : index
    %12 = vector.load %arg10[%c0_15, %c0_16] : memref<64x8xf32, #tpu.memory_space<vmem>>, vector<64x8xf32>
    %cst_17 = arith.constant dense<0.000000e+00> : vector<8x8xf32>
    %13 = tpu.matmul %11, %12, %cst_17 {dimension_numbers = #tpu.dot_dimension_numbers<[1], [0], [0], [1], [0, 0, 1, 1], [], []>} : vector<8x64xf32>, vector<64x8xf32>, vector<8x8xf32> -> vector<8x8xf32>
    %14 = arith.addf %10, %13 : vector<8x8xf32>
    %c0_18 = arith.constant 0 : index
    %c0_19 = arith.constant 0 : index
    %15 = vector.load %arg5[%c0_18, %c0_19] : memref<8x64xf32, #tpu.memory_space<vmem>>, vector<8x64xf32>
    %c0_20 = arith.constant 0 : index
    %c0_21 = arith.constant 0 : index
    %16 = vector.load %arg11[%c0_20, %c0_21] : memref<64x8xf32, #tpu.memory_space<vmem>>, vector<64x8xf32>
    %cst_22 = arith.constant dense<0.000000e+00> : vector<8x8xf32>
    %17 = tpu.matmul %15, %16, %cst_22 {dimension_numbers = #tpu.dot_dimension_numbers<[1], [0], [0], [1], [0, 0, 1, 1], [], []>} : vector<8x64xf32>, vector<64x8xf32>, vector<8x8xf32> -> vector<8x8xf32>
    %18 = arith.addf %14, %17 : vector<8x8xf32>
    %c0_23 = arith.constant 0 : index
    %c0_24 = arith.constant 0 : index
    %19 = vector.load %arg6[%c0_23, %c0_24] : memref<8x64xf32, #tpu.memory_space<vmem>>, vector<8x64xf32>
    %c0_25 = arith.constant 0 : index
    %c0_26 = arith.constant 0 : index
    %20 = vector.load %arg12[%c0_25, %c0_26] : memref<64x8xf32, #tpu.memory_space<vmem>>, vector<64x8xf32>
    %cst_27 = arith.constant dense<0.000000e+00> : vector<8x8xf32>
    %21 = tpu.matmul %19, %20, %cst_27 {dimension_numbers = #tpu.dot_dimension_numbers<[1], [0], [0], [1], [0, 0, 1, 1], [], []>} : vector<8x64xf32>, vector<64x8xf32>, vector<8x8xf32> -> vector<8x8xf32>
    %22 = arith.addf %18, %21 : vector<8x8xf32>
    %c0_28 = arith.constant 0 : index
    %c0_29 = arith.constant 0 : index
    %23 = vector.load %arg13[%c0_28, %c0_29] : memref<1x8xf32, #tpu.memory_space<vmem>>, vector<1x8xf32>
    %24 = vector.broadcast %23 : vector<1x8xf32> to vector<8x8xf32>
    %25 = arith.addf %22, %24 : vector<8x8xf32>
    %26 = arith.negf %25 : vector<8x8xf32>
    %27 = math.exp %26 : vector<8x8xf32>
    %cst_30 = arith.constant 1.000000e+00 : f32
    %28 = vector.broadcast %cst_30 : f32 to vector<8x8xf32>
    %29 = arith.addf %28, %27 : vector<8x8xf32>
    %30 = arith.divf %28, %29 : vector<8x8xf32>
    %c0_31 = arith.constant 0 : index
    %c0_32 = arith.constant 0 : index
    %31 = vector.load %arg14[%c0_31, %c0_32] : memref<8x8xf32, #tpu.memory_space<vmem>>, vector<8x8xf32>
    tpu.vector_store %arg14[%c0_31, %c0_32], %30 {strides = array<i32>} : memref<8x8xf32, #tpu.memory_space<vmem>>, vector<8x8xf32>,
    return
  }
  func.func @transform_0(%arg0: i32) -> (i32, i32) {
    %c0_i32 = arith.constant 0 : i32
    %c0_i32_0 = arith.constant 0 : i32
    return %arg0, %c0_i32 : i32, i32
  }
  func.func @transform_1(%arg0: i32) -> (i32, i32) {
    %c0_i32 = arith.constant 0 : i32
    %c0_i32_0 = arith.constant 0 : i32
    return %arg0, %c0_i32 : i32, i32
  }
  func.func @transform_2(%arg0: i32) -> (i32, i32) {
    %c0_i32 = arith.constant 0 : i32
    %c0_i32_0 = arith.constant 0 : i32
    return %arg0, %c0_i32 : i32, i32
  }
  func.func @transform_3(%arg0: i32) -> (i32, i32) {
    %c0_i32 = arith.constant 0 : i32
    %c0_i32_0 = arith.constant 0 : i32
    return %arg0, %c0_i32 : i32, i32
  }
  func.func @transform_4(%arg0: i32) -> (i32, i32) {
    %c0_i32 = arith.constant 0 : i32
    %c0_i32_0 = arith.constant 0 : i32
    return %arg0, %c0_i32 : i32, i32
  }
  func.func @transform_5(%arg0: i32) -> (i32, i32) {
    %c0_i32 = arith.constant 0 : i32
    %c0_i32_0 = arith.constant 0 : i32
    return %arg0, %c0_i32 : i32, i32
  }
  func.func @transform_6(%arg0: i32) -> (i32, i32) {
    %c0_i32 = arith.constant 0 : i32
    %c0_i32_0 = arith.constant 0 : i32
    %c0_i32_1 = arith.constant 0 : i32
    return %c0_i32, %c0_i32_0 : i32, i32
  }
  func.func @transform_7(%arg0: i32) -> (i32, i32) {
    %c0_i32 = arith.constant 0 : i32
    %c0_i32_0 = arith.constant 0 : i32
    %c0_i32_1 = arith.constant 0 : i32
    return %c0_i32, %c0_i32_0 : i32, i32
  }
  func.func @transform_8(%arg0: i32) -> (i32, i32) {
    %c0_i32 = arith.constant 0 : i32
    %c0_i32_0 = arith.constant 0 : i32
    %c0_i32_1 = arith.constant 0 : i32
    return %c0_i32, %c0_i32_0 : i32, i32
  }
  func.func @transform_9(%arg0: i32) -> (i32, i32) {
    %c0_i32 = arith.constant 0 : i32
    %c0_i32_0 = arith.constant 0 : i32
    %c0_i32_1 = arith.constant 0 : i32
    return %c0_i32, %c0_i32_0 : i32, i32
  }
  func.func @transform_10(%arg0: i32) -> (i32, i32) {
    %c0_i32 = arith.constant 0 : i32
    %c0_i32_0 = arith.constant 0 : i32
    %c0_i32_1 = arith.constant 0 : i32
    return %c0_i32, %c0_i32_0 : i32, i32
  }
  func.func @transform_11(%arg0: i32) -> (i32, i32) {
    %c0_i32 = arith.constant 0 : i32
    %c0_i32_0 = arith.constant 0 : i32
    %c0_i32_1 = arith.constant 0 : i32
    return %c0_i32, %c0_i32_0 : i32, i32
  }
  func.func @transform_12(%arg0: i32) -> (i32, i32) {
    %c0_i32 = arith.constant 0 : i32
    %c0_i32_0 = arith.constant 0 : i32
    %c0_i32_1 = arith.constant 0 : i32
    return %c0_i32, %c0_i32_0 : i32, i32
  }
  func.func @transform_13(%arg0: i32) -> (i32, i32) {
    %c0_i32 = arith.constant 0 : i32
    %c0_i32_0 = arith.constant 0 : i32
    return %arg0, %c0_i32 : i32, i32
  }
}

</mosaic_0001>

<bundles_post_ra>
// kernel: combined_linear_sigmoid.1
= control target key start
LH: loop header
LB: loop body
LE: loop exit
PB: predicated region body
PF: predicated region fallthrough
CT: control target
= control target key end

     0   :  { %s982_s25 = smov 0   ;;  %s1222_s0 = inlined_call_operand.vmem [shape: f32[32,96], index: 0, kind: input, shape index: {}]   ;;  %s1223_s1 = inlined_call_operand.vmem [shape: f32[32,96], index: 1, kind: input, shape index: {}]   ;;  %s1224_s2 = inlined_call_operand.vmem [shape: f32[32,96], index: 2, kind: input, shape index: {}]   ;;  %s1225_s3 = inlined_call_operand.vmem [shape: f32[32,64], index: 3, kind: input, shape index: {}]   ;;  %s1226_s4 = inlined_call_operand.vmem [shape: f32[32,64], index: 4, kind: input, shape index: {}]   ;;  %s1227_s5 = inlined_call_operand.vmem [shape: f32[32,64], index: 5, kind: input, shape index: {}]   ;;  %s1228_s6 = inlined_call_operand.vmem [shape: f32[96,8], index: 6, kind: input, shape index: {}]   ;;  %s1229_s7 = inlined_call_operand.vmem [shape: f32[96,8], index: 7, kind: input, shape index: {}]   ;;  %s1230_s8 = inlined_call_operand.vmem [shape: f32[96,8], index: 8, kind: input, shape index: {}]   ;;  %s1231_s9 = inlined_call_operand.vmem [shape: f32[64,8], index: 9, kind: input, shape index: {}]   ;;  %s1232_s10 = inlined_call_operand.vmem [shape: f32[64,8], index: 10, kind: input, shape index: {}]   ;;  %s1233_s11 = inlined_call_operand.vmem [shape: f32[64,8], index: 11, kind: input, shape index: {}]   ;;  %s1234_s12 = inlined_call_operand.vmem [shape: f32[1,8], index: 12, kind: input, shape index: {}]   ;;  %s1235_s13 = inlined_call_operand.vmem [shape: f32[32,8], index: 13, kind: output, shape index: {}]  }
   0x1 LB: > { %s870_s26 = sadd.s32 4294967295, %s910_s25   ;;  %p874_p0 = scmp.ge.s32.totalorder %s910_s25, 1  ;;  %s910_s25 = sphi %s982_s25, %s23_s25  }
   0x2   : > { %p431_p1 = scmp.lt.s32.totalorder %s910_s25, 5 }
   0x4   : > { %p432_p2 = pnand %p874_p0, %p431_p1 }
   0x5   : > { %p1049_p3 = scmp.lt.s32.totalorder (!%p432_p2), %s870_s26, 3 }
   0x6   : > { %435 = sbr.rel (%p432_p2) target bundleno = 212 (0xd4), region = 72 }
   0xb   : > { %v546_v0 = vld [vmem:[%s1229_s7 + $0x58] sm:$0xff]  ;;  %v545_v3 = vld [vmem:[%s1229_s7 + $0x50] sm:$0xff]  ;;  %v544_v6 = vld [vmem:[%s1229_s7 + $0x48] sm:$0xff]  ;;  %s1238_s26 = smov (!%p1049_p3, %s870_s26), 3  ;;  %vm640_vm0 = vcmask 523264   ;;  %vm547_vm1 = vcmask 785408  }
   0xc   : > { %v606_v1 = vld [vmem:[%s1230_s8 + $0x58] sm:$0xff]  ;;  %555 = vmatpush.msra.mxu0 %v546_v0  ;;  %v605_v4 = vld [vmem:[%s1230_s8 + $0x50] sm:$0xff]  ;;  %v604_v8 = vld [vmem:[%s1230_s8 + $0x48] sm:$0xff]  ;;  %s1105_s22 = sshll.u32 %s1238_s26, 3  ;;  %vm755_vm5 = vcmask 64512  }
   0xd   : > { %v639_v2 = vld [vmem:[%s1231_s9 + $0x38] sm:$0xff]  ;;  %614 = vmatpush.msra.mxu2 %v606_v1  ;;  %v638_v5 = vld [vmem:[%s1231_s9 + $0x30] sm:$0xff]  ;;  %v637_v9 = vld [vmem:[%s1231_s9 + $0x28] sm:$0xff]  ;;  %s508_s21 = scalar_lea.vmem %s1225_s3, %s1105_s22  ;;  %s504_s26 = scalar_lea.vmem %s1224_s2, %s1105_s22 }
   0xe   : > { %652 = vmatpush.msra.mxu3 %v639_v2  ;;  %v533_v7 = vld [vmem:[%s1228_s6 + $0x58] sm:$0xff]  ;;  %556 = vmatpush.msra.mxu0 %v545_v3  ;;  %v532_v10 = vld [vmem:[%s1228_s6 + $0x50] sm:$0xff]  ;;  %v543_v11 = vld [vmem:[%s1229_s7 + $0x40] sm:$0xff]  ;;  %s500_s24 = scalar_lea.vmem %s1223_s1, %s1105_s22  ;;  %s496_s16 = scalar_lea.vmem %s1222_s0, %s1105_s22 }
   0xf   : > { %615 = vmatpush.msra.mxu2 %v605_v4  ;;  %578 = vmatpush.msra.mxu1 %v533_v7  ;;  %v603_v12 = vld [vmem:[%s1230_s8 + $0x40] sm:$0xff]  ;;  %v531_v14 = vld [vmem:[%s1228_s6 + $0x48] sm:$0xff]  ;;  %v542_v15 = vld [vmem:[%s1229_s7 + $0x38] sm:$0xff]  ;;  %s520_s19 = scalar_lea.vmem %s1235_s13, %s1105_s22 }
  0x10   : > { %653 = vmatpush.msra.mxu3 %v638_v5  ;;  %557 = vmatpush.msra.mxu0 %v544_v6  ;;  %v636_v13 = vld [vmem:[%s1231_s9 + $0x20] sm:$0xff]  ;;  %v602_v16 = vld [vmem:[%s1230_s8 + $0x38] sm:$0xff]  ;;  %v541_v19 = vld [vmem:[%s1229_s7 + $0x30] sm:$0xff] }
  0x11   : > { %616 = vmatpush.msra.mxu2 %v604_v8  ;;  %579 = vmatpush.msra.mxu1 %v532_v10  ;;  %v635_v17 = vld [vmem:[%s1231_s9 + $0x18] sm:$0xff]  ;;  %v530_v18 = vld [vmem:[%s1228_s6 + $0x40] sm:$0xff]  ;;  %v601_v20 = vld [vmem:[%s1230_s8 + $0x30] sm:$0xff] }
  0x12   : > { %654 = vmatpush.msra.mxu3 %v637_v9  ;;  %558 = vmatpush.msra.mxu0 %v543_v11  ;;  %v634_v21 = vld [vmem:[%s1231_s9 + $0x10] sm:$0xff]  ;;  %v529_v22 = vld [vmem:[%s1228_s6 + $0x38] sm:$0xff]  ;;  %v540_v23 = vld [vmem:[%s1229_s7 + $0x28] sm:$0xff] }
  0x13   : > { %617 = vmatpush.msra.mxu2 %v603_v12  ;;  %580 = vmatpush.msra.mxu1 %v531_v14  ;;  %v600_v24 = vld [vmem:[%s1230_s8 + $0x28] sm:$0xff]  ;;  %v528_v26 = vld [vmem:[%s1228_s6 + $0x30] sm:$0xff]  ;;  %v539_v27 = vld [vmem:[%s1229_s7 + $0x20] sm:$0xff] }
  0x14   : > { %655 = vmatpush.msra.mxu3 %v636_v13  ;;  %559 = vmatpush.msra.mxu0 %v542_v15  ;;  %v633_v25 = vld [vmem:[%s1231_s9 + $0x8] sm:$0xff]  ;;  %v599_v28 = vld [vmem:[%s1230_s8 + $0x20] sm:$0xff]  ;;  %v673_v31 = vld [vmem:[%s1232_s10 + $0x38] sm:$0xff] }
  0x15   : > { %618 = vmatpush.msra.mxu2 %v602_v16  ;;  %581 = vmatpush.msra.mxu1 %v530_v18  ;;  %v632_v29 = vld [vmem:[%s1231_s9] sm:$0xff]  ;;  %v527_v30 = vld [vmem:[%s1228_s6 + $0x28] sm:$0xff]  ;;  %v538_v32 = vld [vmem:[%s1229_s7 + $0x18] sm:$0xff] }
  0x16   : > { %656 = vmatpush.msra.mxu3 %v635_v17  ;;  %560 = vmatpush.msra.mxu0 %v541_v19  ;;  %v598_v33 = vld [vmem:[%s1230_s8 + $0x18] sm:$0xff]  ;;  %v526_v34 = vld [vmem:[%s1228_s6 + $0x20] sm:$0xff]  ;;  %v672_v35 = vld [vmem:[%s1232_s10 + $0x30] sm:$0xff] }
  0x17   : > { %619 = vmatpush.msra.mxu2 %v601_v20  ;;  %582 = vmatpush.msra.mxu1 %v529_v22  ;;  %v537_v36 = vld [vmem:[%s1229_s7 + $0x10] sm:$0xff]  ;;  %v525_v38 = vld [vmem:[%s1228_s6 + $0x18] sm:$0xff]  ;;  %v671_v39 = vld [vmem:[%s1232_s10 + $0x28] sm:$0xff] }
  0x18   : > { %657 = vmatpush.msra.mxu3 %v634_v21  ;;  %561 = vmatpush.msra.mxu0 %v540_v23  ;;  %v597_v37 = vld [vmem:[%s1230_s8 + $0x10] sm:$0xff]  ;;  %v536_v40 = vld [vmem:[%s1229_s7 + $0x8] sm:$0xff]  ;;  %v670_v43 = vld [vmem:[%s1232_s10 + $0x20] sm:$0xff] }
  0x19   : > { %620 = vmatpush.msra.mxu2 %v600_v24  ;;  %583 = vmatpush.msra.mxu1 %v528_v26  ;;  %v596_v41 = vld [vmem:[%s1230_s8 + $0x8] sm:$0xff]  ;;  %v524_v42 = vld [vmem:[%s1228_s6 + $0x10] sm:$0xff]  ;;  %v535_v44 = vld [vmem:[%s1229_s7] sm:$0xff] }
  0x1a   : > { %658 = vmatpush.msra.mxu3 %v633_v25  ;;  %562 = vmatpush.msra.mxu0 %v539_v27  ;;  %v595_v45 = vld [vmem:[%s1230_s8] sm:$0xff]  ;;  %v669_v48 = vld [vmem:[%s1232_s10 + $0x18] sm:$0xff]  ;;  %v523_v50 = vld [vmem:[%s1228_s6 + $0x8] sm:$0xff] }
  0x1b   : > { %621 = vmatpush.msra.mxu2 %v599_v28  ;;  %584 = vmatpush.msra.mxu1 %v527_v30  ;;  %v631_v46 = vld [vmem:[%s508_s21] sm:$0xff]  ;;  %v706_v49 = vld [vmem:[%s1233_s11 + $0x38] sm:$0xff]  ;;  %v668_v51 = vld [vmem:[%s1232_s10 + $0x10] sm:$0xff]  ;;  %s512_s21 = scalar_lea.vmem %s1226_s4, %s1105_s22 }
  0x1c   : > { %659 = vmatpush.msra.mxu3 %v632_v29  ;;  %563 = vmatpush.msra.mxu0 %v538_v32  ;;  %v594_v47 = vld [vmem:[%s504_s26] sm:$0xff]  ;;  %v705_v53 = vld [vmem:[%s1233_s11 + $0x30] sm:$0xff]  ;;  %v667_v56 = vld [vmem:[%s1232_s10 + $0x8] sm:$0xff] }
  0x1d   : > { %622 = vmatpush.msra.mxu2 %v598_v33  ;;  %585 = vmatpush.msra.mxu1 %v526_v34  ;;  %v534_v52 = vld [vmem:[%s500_s24] sm:$0xff]  ;;  %v704_v57 = vld [vmem:[%s1233_s11 + $0x28] sm:$0xff]  ;;  %v702_v61 = vld [vmem:[%s1233_s11 + $0x18] sm:$0xff] }
  0x1e   : > { %685 = vmatpush.msrb.mxu3 %v673_v31  ;;  %564 = vmatpush.msra.mxu0 %v537_v36  ;;  %v522_v54 = vld [vmem:[%s1228_s6] sm:$0xff]  ;;  %v701_v62 = vld [vmem:[%s1233_s11 + $0x10] sm:$0xff]  ;;  %v700_v63 = vld [vmem:[%s1233_s11 + $0x8] sm:$0xff] }
  0x1f   : > { %623 = vmatpush.msra.mxu2 %v597_v37  ;;  %586 = vmatpush.msra.mxu1 %v525_v38  ;;  %v521_v55 = vld [vmem:[%s496_s16] sm:$0xff] }
  0x20   : > { %686 = vmatpush.msrb.mxu3 %v672_v35  ;;  %565 = vmatpush.msra.mxu0 %v536_v40  ;;  %v666_v58 = vld [vmem:[%s1232_s10] sm:$0xff] }
  0x21   : > { %624 = vmatpush.msra.mxu2 %v596_v41  ;;  %587 = vmatpush.msra.mxu1 %v524_v42  ;;  %v703_v59 = vld [vmem:[%s1233_s11 + $0x20] sm:$0xff] }
  0x22   : > { %687 = vmatpush.msrb.mxu3 %v671_v39  ;;  %566 = vmatpush.msra.mxu0 %v535_v44  ;;  %v665_v60 = vld [vmem:[%s512_s21] sm:$0xff]  ;;  %s516_s21 = scalar_lea.vmem %s1227_s5, %s1105_s22 }
  0x23   : > { %625 = vmatpush.msra.mxu2 %v595_v45  ;;  %885 = vmatmul.msk.f32.vlgmr.msra.gmra.mxu3 %vm640_vm0, %v631_v46  ;;  %v699_v0 = vld [vmem:[%s1233_s11] sm:$0xff] }
  0x24   : > { %688 = vmatpush.msrb.mxu3 %v670_v43  ;;  %884 = vmatmul.msk.f32.vlgmr.msra.gmra.mxu2 %vm547_vm1, %v594_v47  ;;  %v698_v1 = vld [vmem:[%s516_s21] sm:$0xff] }
  0x25   : > { %718 = vmatpush.msrb.mxu0 %v706_v49  ;;  %588 = vmatpush.msra.mxu1 %v523_v50  ;;  %v899_v11 = vld [vmem:[%s1234_s12] ss:$0 sm:$0xff] }
  0x26   : > { %689 = vmatpush.msrb.mxu3 %v669_v48  ;;  %882 = vmatmul.msk.f32.vlgmr.msra.gmra.mxu0 %vm547_vm1, %v534_v52 }
  0x27   : > { %719 = vmatpush.msrb.mxu0 %v705_v53  ;;  %589 = vmatpush.msra.mxu1 %v522_v54 }
  0x28   : > { %690 = vmatpush.msrb.mxu3 %v668_v51  ;;  %883 = vmatmul.msk.f32.vlgmr.msra.gmra.mxu1 %vm547_vm1, %v521_v55 }
  0x29   : > { %720 = vmatpush.msrb.mxu0 %v704_v57 }
  0x2a   : > { %691 = vmatpush.msrb.mxu3 %v667_v56 }
  0x2b   : > { %721 = vmatpush.msrb.mxu0 %v703_v59 }
  0x2c   : > { %692 = vmatpush.msrb.mxu3 %v666_v58 }
  0x2d   : > { %886 = vmatmul.msk.f32.vlgmr.msrb.gmra.mxu3 %vm640_vm0, %v665_v60  ;;  %722 = vmatpush.msrb.mxu0 %v702_v61 }
  0x2f   : > { %723 = vmatpush.msrb.mxu0 %v701_v62 }
  0x31   : > { %724 = vmatpush.msrb.mxu0 %v700_v63 }
  0x33   : > { %725 = vmatpush.msrb.mxu0 %v699_v0 }
  0x34   : > { %887 = vmatmul.msk.f32.vlgmr.msrb.gmra.mxu0 %vm640_vm0, %v698_v1 }
  0xa3   : > { %v568_v2 = vpop.f32.mrf.mxu0 }
  0xa5   : > { %v591_v3 = vpop.f32.mrf.mxu1 }
  0xa6   : > { %v592_v4 = vadd.f32 %v591_v3, %v568_v2  ;;  %v661_v5 = vpop.f32.mrf.mxu3 }
  0xa7   : > { %v627_v6 = vpop.f32.mrf.mxu2 }
  0xa8   : > { %v630_v7 = vadd.f32 %v627_v6, %v592_v4 }
  0xaa   : > { %v664_v8 = vadd.f32 %v661_v5, %v630_v7 }
  0xb0   : > { %v694_v9 = vpop.f32.mrf.mxu3 }
  0xb1   : > { %v697_v10 = vadd.f32 %v694_v9, %v664_v8  ;;  %v727_v12 = vpop.f32.mrf.mxu0 }
  0xb3   : > { %v730_v13 = vadd.f32 %v727_v12, %v697_v10 }
  0xb5   : > { %v735_v14 = vadd.f32 %v899_v11, %v730_v13 }
  0xb7   : > { %v888_v15 = vmul.f32 -1.442695, %v735_v14 }
  0xb9   : > { %900 = vpow2.f32 %v888_v15 }
  0xbf   : > { %v901_v16 = vpop.eup %900 }
  0xc0   : > { %v739_v17 = vadd.f32 1.0, %v901_v16 }
  0xc2   : > { %902 = vrcp.f32 %v739_v17  ;;  %v751_v21 = vand.u32 2147483648, %v739_v17  ;;  %v749_v23 = vand.u32 2147483647, %v739_v17  ;;  %vm745_vm3 = vweird.f32 %v739_v17 }
  0xc4   : > { %v752_v25 = vor.u32 1.1754944e-38, %v751_v21  ;;  %vm750_vm6 = vcmp.eq.f32.partialorder %v749_v23, 8.507059e+37 }
  0xc8   : > { %v903_v18 = vpop.eup %902 }
  0xc9   : > { %v741_v19 = vmul.f32 %v903_v18, %v739_v17  ;;  %vm746_vm2 = vweird.f32 %v903_v18 }
  0xca   : > { %vm747_vm4 = vmor %vm745_vm3, %vm746_vm2 }
  0xcb   : > { %v742_v20 = vsub.f32 1.0, %v741_v19 }
  0xcd   : > { %v743_v22 = vmul.f32 %v903_v18, %v742_v20 }
  0xcf   : > { %v744_v24 = vadd.f32 %v903_v18, %v743_v22 }
  0xd1   : > { %v748_v26 = vsel %vm747_vm4, %v903_v18, %v744_v24 }
  0xd2   : > { %v753_v27 = vsel %vm750_vm6, %v752_v25, %v748_v26 }
  0xd3   : > { %756 = vst.msk [vmem:[%s520_s19] sm:$0xff] %vm755_vm5, %v753_v27 }
  0xd4 PF: > { %s23_s25 = sadd.s32 1, %s910_s25  }
  0xd5   : > { %p20_p4 = scmp.ge.s32.totalorder %s23_s25, 6  }
  0xd7   :  { %22 = sbr.rel (!%p20_p4) target bundleno = 1 (0x1), region = 117 }

</bundles_post_ra>
